<compile_context>
chip_gen: v5e
topology: v5e:2x2
jax: 0.10.0
libtpu: 0.0.40
codegen_flags: <defaults>
</compile_context>

<pallas_src>
import functools

import jax
import jax.numpy as jnp
from jax.experimental import pallas as pl
from jax.experimental.pallas import tpu as pltpu


def _transition_kernel(x_ref, sb_ref, w_ref, o_ref, *stage, compute_dtype):
    """Fused BN(scale/bias) + ReLU + 2x2 sum-pool + 1x1 conv (pool-before-conv).

    x_ref : (TR, W, Cin)   row tile of the fused (N*H) axis, NHWC channels last
    sb_ref: (2, Cin)       row 0 = folded BN scale, row 1 = folded BN bias (f32)
    w_ref : (Cin, Cout)    1x1 conv weight (transposed) with the avg-pool 0.25
                           folded in (bf16 fast path, f32 accumulate)
    stage : optional (TR, W, Cin) f32 VMEM scratch, present only for packed
            (sub-32-bit) activation dtypes
    o_ref : (TR//2, W//2, Cout)
    """
    TR, W, Cin = x_ref.shape
    TR2, W2 = TR // 2, W // 2
    Cout = o_ref.shape[-1]

    sb = sb_ref[...].astype(compute_dtype)
    s = sb[0][None, None, :]                           # (1, 1, Cin)
    b = sb[1][None, None, :]

    if jnp.dtype(x_ref.dtype).itemsize >= 4:
        # 32-bit activations: sublane-strided loads of the even/odd columns
        # fuse the width pool into the load path (lane axis stays contiguous,
        # no XLU relayout).
        x_e = x_ref[:, pl.ds(0, W2, stride=2), :].astype(compute_dtype)
        x_o = x_ref[:, pl.ds(1, W2, stride=2), :].astype(compute_dtype)
        yw = (jnp.maximum(x_e * s + b, 0.0) +
              jnp.maximum(x_o * s + b, 0.0)).astype(jnp.float32)   # (TR, W2, Cin)
    else:
        # Packed (bf16) activations: one contiguous full-tile load, BN+ReLU on
        # the whole tile in compute_dtype (bf16 on v6e/v7x VPUs), then stage
        # through a 32-bit VMEM scratch so the width pool reuses the
        # sublane-strided 32-bit load path.
        y = jnp.maximum(x_ref[...].astype(compute_dtype) * s + b, 0.0)
        st = stage[0]
        st[...] = y.astype(jnp.float32)
        yw = (st[:, pl.ds(0, W2, stride=2), :] +
              st[:, pl.ds(1, W2, stride=2), :])                    # (TR, W2, Cin)

    # ---- height pooling ---------------------------------------------------
    # Row pairs live along the leading (untiled) axis, so this reshape is pure
    # addressing (last two dims untouched).
    yr = yw.reshape(TR2, 2, W2, Cin)
    yp = yr[:, 0, :, :] + yr[:, 1, :, :]                           # (TR2, W2, Cin)

    # ---- 1x1 conv on pooled activations (4x fewer MXU rows) ----------------
    w = w_ref[...]
    if W2 % 8 == 0:
        # Flatten is free: W2 is a sublane-tile multiple.
        m = yp.reshape(TR2 * W2, Cin).astype(w.dtype)
        out = jnp.dot(m, w, preferred_element_type=jnp.float32)
        o_ref[...] = out.reshape(TR2, W2, Cout).astype(o_ref.dtype)
    else:
        # Real DenseNet widths give W2 = 14 / 7: flattening W2 into the matmul
        # M dim would cross (8,128) tile boundaries and relayout every step.
        # Pad W2 up to a sublane multiple with zero rows and drop the junk
        # rows after the matmul instead.
        # TODO(synk): validate this branch on-HW for W2 = 14 / 7 transitions.
        W2p = -(-W2 // 8) * 8
        pad = jnp.zeros((TR2, W2p - W2, Cin), dtype=yp.dtype)
        m = jnp.concatenate([yp, pad], axis=1).reshape(TR2 * W2p, Cin)
        out = jnp.dot(m.astype(w.dtype), w, preferred_element_type=jnp.float32)
        o_ref[...] = out.reshape(TR2, W2p, Cout)[:, :W2, :].astype(o_ref.dtype)


def _tpu_generation():
    try:
        kind = jax.devices()[0].device_kind.lower()
    except Exception:
        return "unknown"
    if "v7" in kind or "7x" in kind:
        return "v7x"
    if "v6" in kind:
        return "v6e"
    if "v5" in kind:
        return "v5e"
    return "unknown"


# (per-step tile-footprint budget, scoped VMEM limit) per TPU generation.
# v5e/v6e: 128 MiB physical VMEM -> 64 MiB scoped / ~24 MiB per-step budget.
# v7x:     64 MiB per TensorCore -> tighter caps.  Unknown chips get the
#          conservative (v7x-safe) plan.
_VMEM_PLAN = {
    "v5e": (24 * 1024 * 1024, 64 * 1024 * 1024),
    "v6e": (24 * 1024 * 1024, 64 * 1024 * 1024),
    "v7x": (16 * 1024 * 1024, 40 * 1024 * 1024),
    "unknown": (16 * 1024 * 1024, 40 * 1024 * 1024),
}


def _pick_tile_rows(R, W, Cin, Cout, in_size, out_size, w_size, staged,
                    budget_bytes, min_steps=8):
    """Largest even row tile (rows of the fused N*H axis) whose per-step VMEM
    footprint fits the budget while keeping at least min(min_steps, R//2) grid
    steps so megacore / both v7x TensorCores have parallel work.

    Footprint = double-buffered input + output blocks, the constant
    scale/bias/weight blocks, in-kernel temporaries (x_e/x_o/yw/yp plus the f32
    matmul result, counted at 4 B/elem to stay conservative) and, for packed
    (bf16) inputs, the 32-bit staging scratch.
    """
    target = max(1, min(min_steps, R // 2))
    best = None
    for tr in range(2, R + 1, 2):
        if R % tr:
            continue
        steps = R // tr
        in_blk = tr * W * Cin * in_size
        out_blk = (tr // 2) * (W // 2) * Cout * out_size
        temps = (tr * W * Cin * 4 * 7) // 4 + (tr // 2) * (W // 2) * Cout * 4
        stage = tr * W * Cin * 4 if staged else 0
        consts = 2 * (2 * Cin * 4 + Cin * Cout * w_size)
        total = 2 * in_blk + 2 * out_blk + temps + stage + consts
        if total > budget_bytes:
            continue
        # Prefer tiles that keep the parallel-step floor; among those, the
        # biggest blocks (fewest steps) win.
        key = (steps >= target, in_blk + out_blk, -steps)
        if best is None or key > best[0]:
            best = (key, tr)
    return 2 if best is None else best[1]


@functools.partial(jax.jit,
                   static_argnames=("eps", "mxu_dtype", "compute_dtype",
                                    "tile_rows", "out_dtype"))
def transition_block_nhwc(x_nhwc, gamma, beta, running_mean, running_var,
                          conv_w, eps=1e-5, mxu_dtype=jnp.bfloat16,
                          compute_dtype=None, tile_rows=None, out_dtype=None):
    """Fast path: NHWC activations in, NHWC activations out (no transposes).

    x_nhwc : (N, H, W, Cin) ; conv_w : (Cout, Cin, 1, 1) PyTorch layout.
    Returns (N, H//2, W//2, Cout) in out_dtype (defaults to x_nhwc.dtype, so a
    bf16 caller gets bf16 out -- recommended: the op is HBM-bound and bf16
    activations halve input+output bytes).
    """
    N, H, W, Cin = x_nhwc.shape
    Cout = conv_w.shape[0]
    assert H % 2 == 0 and W % 2 == 0, "avg_pool2d(2) requires even H and W"

    gen = _tpu_generation()
    if out_dtype is None:
        out_dtype = x_nhwc.dtype
    if compute_dtype is None:
        # bf16 element-wise math on bf16-capable VPUs (v6e/v7x); v5e / unknown
        # chips keep the element-wise stage in f32.
        if x_nhwc.dtype == jnp.bfloat16 and gen in ("v6e", "v7x"):
            compute_dtype = jnp.bfloat16
        else:
            compute_dtype = jnp.float32

    staged = jnp.dtype(x_nhwc.dtype).itemsize < 4
    budget, vmem_limit = _VMEM_PLAN[gen]

    R = N * H
    if tile_rows is None:
        tile_rows = _pick_tile_rows(R, W, Cin, Cout,
                                    jnp.dtype(x_nhwc.dtype).itemsize,
                                    jnp.dtype(out_dtype).itemsize,
                                    jnp.dtype(mxu_dtype).itemsize,
                                    staged, budget)
    assert tile_rows % 2 == 0 and R % tile_rows == 0, (tile_rows, R)

    # Fold BN (inference) into a packed (2, Cin) scale/bias constant; fold the
    # avg-pool 0.25 into the (Cin, Cout) weight so the kernel pools with plain
    # adds and runs a single matmul per tile.
    scale = (gamma / jnp.sqrt(running_var + eps)).astype(jnp.float32)
    bias = (beta - running_mean * scale).astype(jnp.float32)
    sb = jnp.stack([scale, bias], axis=0)                       # (2, Cin) f32
    w = (conv_w[:, :, 0, 0].T * 0.25).astype(mxu_dtype)         # (Cin, Cout)

    # Fuse batch and height into one row axis (free bitcast reshape): one 1-D
    # grid gives big per-step DMAs *and* enough parallel steps even for late
    # transitions with small H.
    x_rows = x_nhwc.reshape(R, W, Cin)

    scratch_shapes = ([pltpu.VMEM((tile_rows, W, Cin), jnp.float32)]
                      if staged else [])
    kernel = functools.partial(_transition_kernel, compute_dtype=compute_dtype)

    out_rows = pl.pallas_call(
        kernel,
        out_shape=jax.ShapeDtypeStruct((R // 2, W // 2, Cout), out_dtype),
        grid_spec=pltpu.PrefetchScalarGridSpec(
            num_scalar_prefetch=0,
            grid=(R // tile_rows,),
            in_specs=[
                pl.BlockSpec((tile_rows, W, Cin), lambda r: (r, 0, 0)),
                pl.BlockSpec((2, Cin), lambda r: (0, 0)),
                pl.BlockSpec((Cin, Cout), lambda r: (0, 0)),
            ],
            out_specs=pl.BlockSpec((tile_rows // 2, W // 2, Cout),
                                   lambda r: (r, 0, 0)),
            scratch_shapes=scratch_shapes,
        ),
        compiler_params=pltpu.CompilerParams(
            dimension_semantics=("parallel",),
            vmem_limit_bytes=vmem_limit,
        ),
    )(x_rows, sb, w)
    return out_rows.reshape(N, H // 2, W // 2, Cout)


def transition_block(x_nchw, gamma, beta, running_mean, running_var, conv_w,
                     eps=1e-5, mxu_dtype=jnp.bfloat16, compute_dtype=None,
                     tile_rows=None, out_dtype=None):
    """PyTorch-layout (NCHW) entry point, matching TransitionBlock.forward.

    NOTE: the two transposes here are NCHW boundary glue only; in a real model
    keep activations NHWC (ideally bf16) end-to-end and call
    transition_block_nhwc directly -- the transposes otherwise dominate HBM
    traffic for this memory-bound op.
    """
    x_nhwc = jnp.transpose(x_nchw, (0, 2, 3, 1))                # NCHW -> NHWC
    out = transition_block_nhwc(x_nhwc, gamma, beta, running_mean, running_var,
                                conv_w, eps=eps, mxu_dtype=mxu_dtype,
                                compute_dtype=compute_dtype,
                                tile_rows=tile_rows, out_dtype=out_dtype)
    return jnp.transpose(out, (0, 3, 1, 2))                     # NHWC -> NCHW


def _reference(x_nchw, gamma, beta, running_mean, running_var, conv_w,
               eps=1e-5):
    """Pure-JAX reference mirroring the PyTorch module (eval mode, drop=0)."""
    scale = gamma / jnp.sqrt(running_var + eps)
    bias = beta - running_mean * scale
    y = x_nchw * scale[None, :, None, None] + bias[None, :, None, None]
    y = jnp.maximum(y, 0.0)
    w = conv_w[:, :, 0, 0]                                       # (Cout, Cin)
    out = jnp.einsum("nchw,oc->nohw", y, w)
    N, Cout, H, W = out.shape
    out = out.reshape(N, Cout, H // 2, 2, W // 2, 2).mean(axis=(3, 5))
    return out


if __name__ == "__main__":
    key = jax.random.PRNGKey(0)
    k_x, k_g, k_b, k_m, k_v, k_w = jax.random.split(key, 6)

    N, Cin, H, W = 2, 8, 16, 16
    Cout = 4

    x = jax.random.normal(k_x, (N, Cin, H, W), dtype=jnp.float32)
    gamma = 1.0 + 0.1 * jax.random.normal(k_g, (Cin,), dtype=jnp.float32)
    beta = 0.1 * jax.random.normal(k_b, (Cin,), dtype=jnp.float32)
    running_mean = 0.1 * jax.random.normal(k_m, (Cin,), dtype=jnp.float32)
    running_var = 0.5 + jnp.abs(jax.random.normal(k_v, (Cin,),
                                                  dtype=jnp.float32))
    conv_w = jax.random.normal(k_w, (Cout, Cin, 1, 1),
                               dtype=jnp.float32) * (2.0 / Cin) ** 0.5

    ref = _reference(x, gamma, beta, running_mean, running_var, conv_w)

    # 1) Default path: f32 activations, bf16 MXU inputs, auto row tiling.
    out = transition_block(x, gamma, beta, running_mean, running_var, conv_w)
    out = jax.block_until_ready(out)
    assert out.shape == (N, Cout, H // 2, W // 2), out.shape
    assert jnp.allclose(out, ref, atol=2e-2, rtol=2e-2), (
        float(jnp.max(jnp.abs(out - ref))))

    # 2) f32 MXU path with explicit row tiling for a tight numerical check of
    #    the fused BN/ReLU/pool/conv math.
    out32 = transition_block(x, gamma, beta, running_mean, running_var, conv_w,
                             mxu_dtype=jnp.float32, tile_rows=8)
    out32 = jax.block_until_ready(out32)
    assert jnp.allclose(out32, ref, atol=2e-4, rtol=2e-4), (
        float(jnp.max(jnp.abs(out32 - ref))))

    # 3) bf16 activations in / bf16 out (recommended memory-bound fast path);
    #    compared against the reference evaluated on the quantized input.
    x_bf16 = x.astype(jnp.bfloat16)
    out_bf = transition_block(x_bf16, gamma, beta, running_mean, running_var,
                              conv_w)
    out_bf = jax.block_until_ready(out_bf)
    assert out_bf.dtype == jnp.bfloat16, out_bf.dtype
    ref_bf = _reference(x_bf16.astype(jnp.float32), gamma, beta, running_mean,
                        running_var, conv_w)
    assert jnp.allclose(out_bf.astype(jnp.float32), ref_bf,
                        atol=6e-2, rtol=6e-2), (
        float(jnp.max(jnp.abs(out_bf.astype(jnp.float32) - ref_bf))))

    print("KERNEL_OK")
</pallas_src>

<mosaic_0001>
module attributes {stable_mosaic.version = 11 : i64} {
  func.func @_transition_kernel(%arg0: i32, %arg1: memref<4x16x8xf32, #tpu.memory_space<vmem>>, %arg2: memref<2x8xf32, #tpu.memory_space<vmem>>, %arg3: memref<8x4xbf16, #tpu.memory_space<vmem>>, %arg4: memref<2x8x4xf32, #tpu.memory_space<vmem>>) attributes {dimension_semantics = [#tpu.dimension_semantics<parallel>], iteration_bounds = array<i64: 8>, scalar_prefetch = 0 : i64, scratch_operands = 0 : i64, tpu.core_type = #tpu.core_type<tc>, window_params = [{transform_indices = @transform_0, window_bounds = array<i64: 4, 16, 8>}, {pipeline_mode = #tpu.pipeline_mode<synchronous>, transform_indices = @transform_1, window_bounds = array<i64: 2, 8>}, {pipeline_mode = #tpu.pipeline_mode<synchronous>, transform_indices = @transform_2, window_bounds = array<i64: 8, 4>}, {transform_indices = @transform_3, window_bounds = array<i64: 2, 8, 4>}]} {
    %c0 = arith.constant 0 : index
    %c0_0 = arith.constant 0 : index
    %0 = vector.load %arg2[%c0, %c0_0] : memref<2x8xf32, #tpu.memory_space<vmem>>, vector<2x8xf32>
    %1 = vector.extract_strided_slice %0 {offsets = [0, 0], sizes = [1, 8], strides = [1, 1]} : vector<2x8xf32> to vector<1x8xf32>
    %2 = vector.shape_cast %1 : vector<1x8xf32> to vector<8xf32>
    %3 = vector.shape_cast %2 : vector<8xf32> to vector<1x1x8xf32>
    %4 = vector.extract_strided_slice %0 {offsets = [1, 0], sizes = [1, 8], strides = [1, 1]} : vector<2x8xf32> to vector<1x8xf32>
    %5 = vector.shape_cast %4 : vector<1x8xf32> to vector<8xf32>
    %6 = vector.shape_cast %5 : vector<8xf32> to vector<1x1x8xf32>
    %c0_1 = arith.constant 0 : index
    %c0_2 = arith.constant 0 : index
    %c0_3 = arith.constant 0 : index
    %7 = tpu.strided_load %arg1[%c0_1, %c0_2, %c0_3] {strides = array<i32: 1, 2, 1>} : memref<4x16x8xf32, #tpu.memory_space<vmem>>, vector<4x8x8xf32>
    %c0_4 = arith.constant 0 : index
    %c1 = arith.constant 1 : index
    %c0_5 = arith.constant 0 : index
    %8 = tpu.strided_load %arg1[%c0_4, %c1, %c0_5] {strides = array<i32: 1, 2, 1>} : memref<4x16x8xf32, #tpu.memory_space<vmem>>, vector<4x8x8xf32>
    %9 = vector.broadcast %3 : vector<1x1x8xf32> to vector<4x8x8xf32>
    %10 = arith.mulf %7, %9 : vector<4x8x8xf32>
    %11 = vector.broadcast %6 : vector<1x1x8xf32> to vector<4x8x8xf32>
    %12 = arith.addf %10, %11 : vector<4x8x8xf32>
    %cst = arith.constant 0.000000e+00 : f32
    %13 = vector.broadcast %cst : f32 to vector<4x8x8xf32>
    %14 = arith.maximumf %12, %13 : vector<4x8x8xf32>
    %15 = vector.broadcast %3 : vector<1x1x8xf32> to vector<4x8x8xf32>
    %16 = arith.mulf %8, %15 : vector<4x8x8xf32>
    %17 = vector.broadcast %6 : vector<1x1x8xf32> to vector<4x8x8xf32>
    %18 = arith.addf %16, %17 : vector<4x8x8xf32>
    %cst_6 = arith.constant 0.000000e+00 : f32
    %19 = vector.broadcast %cst_6 : f32 to vector<4x8x8xf32>
    %20 = arith.maximumf %18, %19 : vector<4x8x8xf32>
    %21 = arith.addf %14, %20 : vector<4x8x8xf32>
    %22 = vector.shape_cast %21 : vector<4x8x8xf32> to vector<2x2x8x8xf32>
    %23 = vector.extract_strided_slice %22 {offsets = [0, 0, 0, 0], sizes = [2, 1, 8, 8], strides = [1, 1, 1, 1]} : vector<2x2x8x8xf32> to vector<2x1x8x8xf32>
    %24 = vector.shape_cast %23 : vector<2x1x8x8xf32> to vector<2x8x8xf32>
    %25 = vector.extract_strided_slice %22 {offsets = [0, 1, 0, 0], sizes = [2, 1, 8, 8], strides = [1, 1, 1, 1]} : vector<2x2x8x8xf32> to vector<2x1x8x8xf32>
    %26 = vector.shape_cast %25 : vector<2x1x8x8xf32> to vector<2x8x8xf32>
    %27 = arith.addf %24, %26 : vector<2x8x8xf32>
    %c0_7 = arith.constant 0 : index
    %c0_8 = arith.constant 0 : index
    %28 = vector.load %arg3[%c0_7, %c0_8] : memref<8x4xbf16, #tpu.memory_space<vmem>>, vector<8x4xbf16>
    %29 = vector.shape_cast %27 : vector<2x8x8xf32> to vector<16x8xf32>
    %30 = arith.truncf %29 : vector<16x8xf32> to vector<16x8xbf16>
    %cst_9 = arith.constant dense<0.000000e+00> : vector<16x4xf32>
    %31 = tpu.matmul %30, %28, %cst_9 {dimension_numbers = #tpu.dot_dimension_numbers<[1], [0], [0], [1], [0, 0, 1, 1], [], []>} : vector<16x8xbf16>, vector<8x4xbf16>, vector<16x4xf32> -> vector<16x4xf32>
    %32 = vector.shape_cast %31 : vector<16x4xf32> to vector<2x8x4xf32>
    %c0_10 = arith.constant 0 : index
    %c0_11 = arith.constant 0 : index
    %c0_12 = arith.constant 0 : index
    %33 = vector.load %arg4[%c0_10, %c0_11, %c0_12] : memref<2x8x4xf32, #tpu.memory_space<vmem>>, vector<2x8x4xf32>
    tpu.vector_store %arg4[%c0_10, %c0_11, %c0_12], %32 {strides = array<i32>} : memref<2x8x4xf32, #tpu.memory_space<vmem>>, vector<2x8x4xf32>,
    return
  }
  func.func @transform_0(%arg0: i32) -> (i32, i32, i32) {
    %c0_i32 = arith.constant 0 : i32
    %c0_i32_0 = arith.constant 0 : i32
    %c0_i32_1 = arith.constant 0 : i32
    return %arg0, %c0_i32, %c0_i32_0 : i32, i32, i32
  }
  func.func @transform_1(%arg0: i32) -> (i32, i32) {
    %c0_i32 = arith.constant 0 : i32
    %c0_i32_0 = arith.constant 0 : i32
    %c0_i32_1 = arith.constant 0 : i32
    return %c0_i32, %c0_i32_0 : i32, i32
  }
  func.func @transform_2(%arg0: i32) -> (i32, i32) {
    %c0_i32 = arith.constant 0 : i32
    %c0_i32_0 = arith.constant 0 : i32
    %c0_i32_1 = arith.constant 0 : i32
    return %c0_i32, %c0_i32_0 : i32, i32
  }
  func.func @transform_3(%arg0: i32) -> (i32, i32, i32) {
    %c0_i32 = arith.constant 0 : i32
    %c0_i32_0 = arith.constant 0 : i32
    %c0_i32_1 = arith.constant 0 : i32
    return %arg0, %c0_i32, %c0_i32_0 : i32, i32, i32
  }
}

</mosaic_0001>

<bundles_post_ra>
// kernel: transition_block_nhwc.1
= control target key start
LH: loop header
LB: loop body
LE: loop exit
PB: predicated region body
PF: predicated region fallthrough
CT: control target
= control target key end

     0   :  { %s366_s12 = smov 0   ;;  %s393_s0 = inlined_call_operand.vmem [shape: f32[32,16,8], index: 0, kind: input, shape index: {}]   ;;  %s394_s1 = inlined_call_operand.vmem [shape: f32[2,8], index: 1, kind: input, shape index: {}]   ;;  %s395_s2 = inlined_call_operand.vmem [shape: bf16[8,4], index: 2, kind: input, shape index: {}]   ;;  %s396_s3 = inlined_call_operand.vmem [shape: f32[16,8,4], index: 3, kind: output, shape index: {}]  }
   0x1 LB: > { %s309_s13 = sadd.s32 4294967295, %s344_s12   ;;  %p313_p0 = scmp.ge.s32.totalorder %s344_s12, 1  ;;  %s344_s12 = sphi %s366_s12, %s13_s12  }
   0x2   : > { %p139_p1 = scmp.lt.s32.totalorder %s344_s12, 9 }
   0x4   : > { %p140_p2 = pnand %p313_p0, %p139_p1 }
   0x5   : > { %s314_s16 = sshll.u32 (!%p140_p2), %s309_s13, 2  ;;  %s317_s23 = sshll.u32 (!%p140_p2), %s309_s13, 1 }
   0x6   : > { %143 = sbr.rel (%p140_p2) target bundleno = 164 (0xa4), region = 32  ;;  %p165_p3 = scmp.lt.s32.totalorder (!%p140_p2), %s314_s16, 31 }
   0x7   : > { %p172_p4 = scmp.lt.s32.totalorder (!%p140_p2), %s317_s23, 15 }
   0xb   : > { %v226_v0 = vld [vmem:[%s395_s2] sm:$0xf]  ;;  %vm232_vm0 = vcmask 1043456   ;;  %s398_s16 = smov (!%p165_p3, %s314_s16), 31  ;;  %vm228_vm1 = vcmask 64512   ;;  %s400_s23 = smov (!%p172_p4, %s317_s23), 15 }
   0xc   : > { %v234_v1 = vsel %vm232_vm0, %v226_v0, 0  ;;  %v178_v2 = vld [vmem:[%s394_s1] sm:$0x3]  ;;  %s329_s19 = sshll.u32 %s398_s16, 4  ;;  %s318_s24 = sshll.u32 %s400_s23, 3  ;;  %vm250_vm2 = vcmask 31744  }
   0xd   : > { %243 = vmatpush.bf16.msra.mxu0 %v234_v1  ;;  %v194_v3 = vperm.slane %v178_v2, 0  ;;  %s169_s22 = scalar_lea.vmem %s393_s0, %s329_s19  ;;  %v199_v4 = vperm.slane %v178_v2, 1  ;;  %s175_s27 = scalar_lea.vmem %s396_s3, %s318_s24 }
   0xe   : > { %v179_v5 = vld [vmem:[%s169_s22] ss:$2 sm:$0xff]  ;;  %v319_v6 = vld [vmem:[%s169_s22 + $0x10] ss:$2 sm:$0xff]  ;;  %v322_v9 = vld [vmem:[%s169_s22 + $0x1] ss:$2 sm:$0xff] }
   0xf   : > { %v320_v7 = vld [vmem:[%s169_s22 + $0x20] ss:$2 sm:$0xff]  ;;  %v321_v8 = vld [vmem:[%s169_s22 + $0x30] ss:$2 sm:$0xff]  ;;  %v323_v10 = vld [vmem:[%s169_s22 + $0x11] ss:$2 sm:$0xff]  ;;  %v195_v11 = vmul.f32 %v194_v3, %v179_v5  ;;  %v196_v12 = vmul.f32 %v319_v6, %v194_v3  ;;  %v208_v17 = vmul.f32 %v322_v9, %v194_v3 }
  0x10   : > { %v197_v13 = vmul.f32 %v320_v7, %v194_v3  ;;  %v324_v14 = vld [vmem:[%s169_s22 + $0x21] ss:$2 sm:$0xff]  ;;  %v325_v15 = vld [vmem:[%s169_s22 + $0x31] ss:$2 sm:$0xff]  ;;  %v198_v16 = vmul.f32 %v321_v8, %v194_v3  ;;  %v209_v18 = vmul.f32 %v323_v10, %v194_v3 }
  0x11   : > { %v200_v19 = vadd.f32 %v199_v4, %v195_v11  ;;  %v201_v20 = vadd.f32 %v199_v4, %v196_v12  ;;  %v210_v22 = vmul.f32 %v324_v14, %v194_v3  ;;  %v211_v24 = vmul.f32 %v325_v15, %v194_v3 }
  0x12   : > { %v202_v21 = vadd.f32 %v199_v4, %v197_v13  ;;  %v203_v23 = vadd.f32 %v199_v4, %v198_v16  ;;  %v212_v25 = vadd.f32 %v208_v17, %v199_v4  ;;  %v213_v26 = vadd.f32 %v209_v18, %v199_v4 }
  0x13   : > { %v204_v27 = vmax.f32 %v200_v19, 0.0  ;;  %v205_v28 = vmax.f32 %v201_v20, 0.0  ;;  %v214_v30 = vadd.f32 %v210_v22, %v199_v4  ;;  %v215_v32 = vadd.f32 %v211_v24, %v199_v4 }
  0x14   : > { %v206_v29 = vmax.f32 %v202_v21, 0.0  ;;  %v207_v31 = vmax.f32 %v203_v23, 0.0  ;;  %v216_v33 = vmax.f32 %v212_v25, 0.0  ;;  %v217_v34 = vmax.f32 %v213_v26, 0.0 }
  0x15   : > { %v218_v35 = vmax.f32 %v214_v30, 0.0  ;;  %v219_v36 = vmax.f32 %v215_v32, 0.0 }
  0x16   : > { %v220_v37 = vadd.f32 %v216_v33, %v204_v27  ;;  %v221_v38 = vadd.f32 %v217_v34, %v205_v28 }
  0x17   : > { %v222_v39 = vadd.f32 %v218_v35, %v206_v29  ;;  %v223_v40 = vadd.f32 %v219_v36, %v207_v31 }
  0x18   : > { %v224_v41 = vadd.f32 %v221_v38, %v220_v37 }
  0x19   : > { %v225_v42 = vadd.f32 %v223_v40, %v222_v39 }
  0x1b   : > { %v227_v43 = vpack.c.bf16 %v225_v42, %v224_v41 }
  0x1d   : > { %326 = vmatmul.msk.bf16.vlgmr.msra.gmra.mxu0 %vm228_vm1, %v227_v43 }
  0x9a   : > { %v245_v44 = vpop.f32.mrf.mxu0 }
  0x9b   : > { %251 = vst.msk [vmem:[%s175_s27] sm:$0xff] %vm250_vm2, %v245_v44 }
  0xa2   : > { %v247_v45 = vpop.f32.mrf.mxu0 }
  0xa3   : > { %252 = vst.msk [vmem:[%s175_s27 + $0x8] sm:$0xff] %vm250_vm2, %v247_v45 }
  0xa4 PF: > { %s13_s12 = sadd.s32 1, %s344_s12  }
  0xa5   : > { %p10_p5 = scmp.ge.s32.totalorder %s13_s12, 10  }
  0xa7   :  { %12 = sbr.rel (!%p10_p5) target bundleno = 1 (0x1), region = 69 }

</bundles_post_ra>
